<compile_context>
chip_gen: v6e
topology: v6e:2x2x1
jax: 0.10.0
libtpu: 0.0.40
codegen_flags: <defaults>
</compile_context>

<pallas_src>
from functools import partial

import jax
import jax.numpy as jnp
from jax.experimental import pallas as pl
from jax.experimental.pallas import tpu as pltpu


def _round_up(x, m):
    return ((x + m - 1) // m) * m


def _cdiv(a, b):
    return -(-a // b)


def critic_kernel(x_ref, w1_ref, b1_ref, w2_ref, b2_ref, w3_ref, b3_ref, o_ref):
    # x_ref: (tb, obs_dim) f32; w1 f32; w2/w3 bf16; biases f32; o_ref f32.
    x = x_ref[...]

    # fc1 in f32 (tiny K; keeps observation precision), then bf16 ReLU.
    h1 = jnp.dot(x, w1_ref[...], preferred_element_type=jnp.float32) + b1_ref[...]
    h1 = jnp.maximum(h1.astype(jnp.bfloat16), 0)

    # fc2: bf16 MXU inputs, f32 accumulation, bf16 ReLU.
    h2 = jnp.dot(h1, w2_ref[...], preferred_element_type=jnp.float32) + b2_ref[...]
    h2 = jnp.maximum(h2.astype(jnp.bfloat16), 0)

    # fc3: bf16 MXU inputs, f32 accumulation; store the real (narrow) columns.
    o_ref[...] = jnp.dot(h2, w3_ref[...], preferred_element_type=jnp.float32) + b3_ref[...]


def prepare_params(params):
    """One-time cast/layout of the Linear params for the kernel.

    Returns (w1 f32, b1 f32[1,512], w2 bf16, b2 f32[1,128], w3 bf16, b3 f32[1,out]).
    Do this once (outside the per-step call path), not on every forward.
    """
    w1, b1, w2, b2, w3, b3 = params
    return (
        w1.astype(jnp.float32),
        b1.reshape(1, -1).astype(jnp.float32),
        w2.astype(jnp.bfloat16),
        b2.reshape(1, -1).astype(jnp.float32),
        w3.astype(jnp.bfloat16),
        b3.reshape(1, -1).astype(jnp.float32),
    )


@partial(jax.jit, static_argnames=("obs_dim", "act_dim", "q_num", "tile_b"))
def critic_forward(x, prepared_params, obs_dim, act_dim, q_num, tile_b=2048):
    """x: any shape reshapable to (-1, obs_dim). Returns (mb, act_dim, q_num) f32."""
    w1, b1, w2, b2, w3, b3 = prepared_params
    x2d = x.reshape(-1, obs_dim).astype(jnp.float32)
    mb = x2d.shape[0]
    out_dim = act_dim * q_num

    if mb == 0:  # empty-batch edge case
        return jnp.zeros((0, act_dim, q_num), jnp.float32)

    # Minimal batch padding: align to 8 rows, then pick a tile (multiple of 8)
    # that divides the padded batch evenly.
    mb8 = _round_up(mb, 8)
    nsteps = _cdiv(mb8, tile_b)
    tb = _round_up(_cdiv(mb8, nsteps), 8)
    mb_pad = nsteps * tb
    if mb_pad != mb:
        x2d = jnp.pad(x2d, ((0, mb_pad - mb), (0, 0)))

    grid = (nsteps,)

    flops = 2 * mb_pad * (obs_dim * 512 + 512 * 128 + 128 * out_dim)
    bytes_accessed = (
        mb_pad * obs_dim * 4                                   # x (f32)
        + mb_pad * out_dim * 4                                 # out (f32)
        + obs_dim * 512 * 4 + 512 * 128 * 2 + 128 * out_dim * 2  # weights
        + (512 + 128 + out_dim) * 4                            # biases (f32)
    )

    out2d = pl.pallas_call(
        critic_kernel,
        out_shape=jax.ShapeDtypeStruct((mb_pad, out_dim), jnp.float32),
        grid=grid,
        in_specs=[
            pl.BlockSpec((tb, obs_dim), lambda i: (i, 0)),   # x tile (pipelined)
            pl.BlockSpec((obs_dim, 512), lambda i: (0, 0)),  # w1 (resident, f32)
            pl.BlockSpec((1, 512), lambda i: (0, 0)),        # b1
            pl.BlockSpec((512, 128), lambda i: (0, 0)),      # w2 (resident, bf16)
            pl.BlockSpec((1, 128), lambda i: (0, 0)),        # b2
            pl.BlockSpec((128, out_dim), lambda i: (0, 0)),  # w3 (resident, bf16)
            pl.BlockSpec((1, out_dim), lambda i: (0, 0)),    # b3
        ],
        out_specs=pl.BlockSpec((tb, out_dim), lambda i: (i, 0)),
        compiler_params=pltpu.CompilerParams(
            # TODO(synk): on v7x consider pltpu.CORE_PARALLEL / pl.core_map to
            # guarantee both TensorCores engage; "parallel" is portable/safe.
            dimension_semantics=("parallel",),
            vmem_limit_bytes=32 * 1024 * 1024,
        ),
        cost_estimate=pl.CostEstimate(
            flops=flops, transcendentals=0, bytes_accessed=bytes_accessed
        ),
    )(x2d, w1, b1, w2, b2, w3, b3)

    if mb_pad != mb:
        out2d = out2d[:mb]
    return out2d.reshape(mb, act_dim, q_num)


def init_params(key, obs_dim, act_dim, q_num):
    """Deterministic init mimicking nn.Linear's U(-1/sqrt(fan_in), 1/sqrt(fan_in)).

    Weights stored as (in_features, out_features) so each layer is `x @ W + b`.
    """
    dims = [(obs_dim, 512), (512, 128), (128, act_dim * q_num)]
    params = []
    for (fan_in, fan_out) in dims:
        key, kw, kb = jax.random.split(key, 3)
        bound = 1.0 / jnp.sqrt(jnp.float32(fan_in))
        w = jax.random.uniform(kw, (fan_in, fan_out), jnp.float32, -bound, bound)
        b = jax.random.uniform(kb, (1, fan_out), jnp.float32, -bound, bound)
        params += [w, b]
    return tuple(params)


if __name__ == "__main__":
    obs_dim, act_dim, q_num = 32, 4, 8
    batch = 2

    key = jax.random.PRNGKey(0)
    key, kx = jax.random.split(key)
    x = jax.random.normal(kx, (batch, obs_dim), jnp.float32)

    params = init_params(key, obs_dim, act_dim, q_num)
    prepared = prepare_params(params)           # one-time cast outside hot path

    out = critic_forward(x, prepared, obs_dim, act_dim, q_num)
    out = jax.block_until_ready(out)

    # Reference in plain JAX (full f32). Kernel runs fc1 in f32 and fc2/fc3
    # with bf16 MXU inputs + f32 accumulation, so tolerance is loosened.
    w1, b1, w2, b2, w3, b3 = params
    h = jnp.maximum(x @ w1 + b1, 0.0)
    h = jnp.maximum(h @ w2 + b2, 0.0)
    ref = (h @ w3 + b3).reshape(batch, act_dim, q_num)

    assert out.shape == (batch, act_dim, q_num), out.shape
    assert jnp.allclose(out, ref, atol=5e-2, rtol=5e-2), (
        float(jnp.max(jnp.abs(out - ref)))
    )
    print("KERNEL_OK")
</pallas_src>

<mosaic_0001>
module attributes {stable_mosaic.version = 11 : i64} {
  func.func @critic_kernel(%arg0: i32, %arg1: memref<8x32xf32, #tpu.memory_space<vmem>>, %arg2: memref<32x512xf32, #tpu.memory_space<vmem>>, %arg3: memref<1x512xf32, #tpu.memory_space<vmem>>, %arg4: memref<512x128xbf16, #tpu.memory_space<vmem>>, %arg5: memref<1x128xf32, #tpu.memory_space<vmem>>, %arg6: memref<128x32xbf16, #tpu.memory_space<vmem>>, %arg7: memref<1x32xf32, #tpu.memory_space<vmem>>, %arg8: memref<8x32xf32, #tpu.memory_space<vmem>>) attributes {dimension_semantics = [#tpu.dimension_semantics<parallel>], iteration_bounds = array<i64: 1>, scalar_prefetch = 0 : i64, scratch_operands = 0 : i64, tpu.core_type = #tpu.core_type<tc>, window_params = [{transform_indices = @transform_0, window_bounds = array<i64: 8, 32>}, {pipeline_mode = #tpu.pipeline_mode<synchronous>, transform_indices = @transform_1, window_bounds = array<i64: 32, 512>}, {pipeline_mode = #tpu.pipeline_mode<synchronous>, transform_indices = @transform_2, window_bounds = array<i64: 1, 512>}, {pipeline_mode = #tpu.pipeline_mode<synchronous>, transform_indices = @transform_3, window_bounds = array<i64: 512, 128>}, {pipeline_mode = #tpu.pipeline_mode<synchronous>, transform_indices = @transform_4, window_bounds = array<i64: 1, 128>}, {pipeline_mode = #tpu.pipeline_mode<synchronous>, transform_indices = @transform_5, window_bounds = array<i64: 128, 32>}, {pipeline_mode = #tpu.pipeline_mode<synchronous>, transform_indices = @transform_6, window_bounds = array<i64: 1, 32>}, {transform_indices = @transform_7, window_bounds = array<i64: 8, 32>}]} {
    %c0 = arith.constant 0 : index
    %c0_0 = arith.constant 0 : index
    %0 = vector.load %arg1[%c0, %c0_0] : memref<8x32xf32, #tpu.memory_space<vmem>>, vector<8x32xf32>
    %c0_1 = arith.constant 0 : index
    %c0_2 = arith.constant 0 : index
    %1 = vector.load %arg2[%c0_1, %c0_2] : memref<32x512xf32, #tpu.memory_space<vmem>>, vector<32x512xf32>
    %cst = arith.constant dense<0.000000e+00> : vector<8x512xf32>
    %2 = tpu.matmul %0, %1, %cst {dimension_numbers = #tpu.dot_dimension_numbers<[1], [0], [0], [1], [0, 0, 1, 1], [], []>} : vector<8x32xf32>, vector<32x512xf32>, vector<8x512xf32> -> vector<8x512xf32>
    %c0_3 = arith.constant 0 : index
    %c0_4 = arith.constant 0 : index
    %3 = vector.load %arg3[%c0_3, %c0_4] : memref<1x512xf32, #tpu.memory_space<vmem>>, vector<1x512xf32>
    %4 = vector.broadcast %3 : vector<1x512xf32> to vector<8x512xf32>
    %5 = arith.addf %2, %4 : vector<8x512xf32>
    %6 = arith.truncf %5 : vector<8x512xf32> to vector<8x512xbf16>
    %cst_5 = arith.constant 0.000000e+00 : bf16
    %7 = vector.broadcast %cst_5 : bf16 to vector<8x512xbf16>
    %8 = arith.maximumf %6, %7 : vector<8x512xbf16>
    %c0_6 = arith.constant 0 : index
    %c0_7 = arith.constant 0 : index
    %9 = vector.load %arg4[%c0_6, %c0_7] : memref<512x128xbf16, #tpu.memory_space<vmem>>, vector<512x128xbf16>
    %cst_8 = arith.constant dense<0.000000e+00> : vector<8x128xf32>
    %10 = tpu.matmul %8, %9, %cst_8 {dimension_numbers = #tpu.dot_dimension_numbers<[1], [0], [0], [1], [0, 0, 1, 1], [], []>} : vector<8x512xbf16>, vector<512x128xbf16>, vector<8x128xf32> -> vector<8x128xf32>
    %c0_9 = arith.constant 0 : index
    %c0_10 = arith.constant 0 : index
    %11 = vector.load %arg5[%c0_9, %c0_10] : memref<1x128xf32, #tpu.memory_space<vmem>>, vector<1x128xf32>
    %12 = vector.broadcast %11 : vector<1x128xf32> to vector<8x128xf32>
    %13 = arith.addf %10, %12 : vector<8x128xf32>
    %14 = arith.truncf %13 : vector<8x128xf32> to vector<8x128xbf16>
    %cst_11 = arith.constant 0.000000e+00 : bf16
    %15 = vector.broadcast %cst_11 : bf16 to vector<8x128xbf16>
    %16 = arith.maximumf %14, %15 : vector<8x128xbf16>
    %c0_12 = arith.constant 0 : index
    %c0_13 = arith.constant 0 : index
    %17 = vector.load %arg6[%c0_12, %c0_13] : memref<128x32xbf16, #tpu.memory_space<vmem>>, vector<128x32xbf16>
    %cst_14 = arith.constant dense<0.000000e+00> : vector<8x32xf32>
    %18 = tpu.matmul %16, %17, %cst_14 {dimension_numbers = #tpu.dot_dimension_numbers<[1], [0], [0], [1], [0, 0, 1, 1], [], []>} : vector<8x128xbf16>, vector<128x32xbf16>, vector<8x32xf32> -> vector<8x32xf32>
    %c0_15 = arith.constant 0 : index
    %c0_16 = arith.constant 0 : index
    %19 = vector.load %arg7[%c0_15, %c0_16] : memref<1x32xf32, #tpu.memory_space<vmem>>, vector<1x32xf32>
    %20 = vector.broadcast %19 : vector<1x32xf32> to vector<8x32xf32>
    %21 = arith.addf %18, %20 : vector<8x32xf32>
    %c0_17 = arith.constant 0 : index
    %c0_18 = arith.constant 0 : index
    %22 = vector.load %arg8[%c0_17, %c0_18] : memref<8x32xf32, #tpu.memory_space<vmem>>, vector<8x32xf32>
    tpu.vector_store %arg8[%c0_17, %c0_18], %21 {strides = array<i32>} : memref<8x32xf32, #tpu.memory_space<vmem>>, vector<8x32xf32>,
    return
  }
  func.func @transform_0(%arg0: i32) -> (i32, i32) {
    %c0_i32 = arith.constant 0 : i32
    %c0_i32_0 = arith.constant 0 : i32
    return %arg0, %c0_i32 : i32, i32
  }
  func.func @transform_1(%arg0: i32) -> (i32, i32) {
    %c0_i32 = arith.constant 0 : i32
    %c0_i32_0 = arith.constant 0 : i32
    %c0_i32_1 = arith.constant 0 : i32
    return %c0_i32, %c0_i32_0 : i32, i32
  }
  func.func @transform_2(%arg0: i32) -> (i32, i32) {
    %c0_i32 = arith.constant 0 : i32
    %c0_i32_0 = arith.constant 0 : i32
    %c0_i32_1 = arith.constant 0 : i32
    return %c0_i32, %c0_i32_0 : i32, i32
  }
  func.func @transform_3(%arg0: i32) -> (i32, i32) {
    %c0_i32 = arith.constant 0 : i32
    %c0_i32_0 = arith.constant 0 : i32
    %c0_i32_1 = arith.constant 0 : i32
    return %c0_i32, %c0_i32_0 : i32, i32
  }
  func.func @transform_4(%arg0: i32) -> (i32, i32) {
    %c0_i32 = arith.constant 0 : i32
    %c0_i32_0 = arith.constant 0 : i32
    %c0_i32_1 = arith.constant 0 : i32
    return %c0_i32, %c0_i32_0 : i32, i32
  }
  func.func @transform_5(%arg0: i32) -> (i32, i32) {
    %c0_i32 = arith.constant 0 : i32
    %c0_i32_0 = arith.constant 0 : i32
    %c0_i32_1 = arith.constant 0 : i32
    return %c0_i32, %c0_i32_0 : i32, i32
  }
  func.func @transform_6(%arg0: i32) -> (i32, i32) {
    %c0_i32 = arith.constant 0 : i32
    %c0_i32_0 = arith.constant 0 : i32
    %c0_i32_1 = arith.constant 0 : i32
    return %c0_i32, %c0_i32_0 : i32, i32
  }
  func.func @transform_7(%arg0: i32) -> (i32, i32) {
    %c0_i32 = arith.constant 0 : i32
    %c0_i32_0 = arith.constant 0 : i32
    return %arg0, %c0_i32 : i32, i32
  }
}

</mosaic_0001>

<bundles_post_ra>
// kernel: critic_forward.1
= control target key start
LH: loop header
LB: loop body
LE: loop exit
PB: predicated region body
PF: predicated region fallthrough
CT: control target
= control target key end

     0   :  { %12 = vsyncpa [#allocation3], 0  ;;  %s1029_s0 = inlined_call_operand.vmem [shape: f32[8,32], index: 0, kind: input, shape index: {}]   ;;  %s1030_s1 = inlined_call_operand.hbm [shape: f32[32,512], index: 1, kind: input, shape index: {}]   ;;  %s1031_s2 = inlined_call_operand.vmem [shape: f32[1,512], index: 2, kind: input, shape index: {}]   ;;  %s1032_s3 = inlined_call_operand.hbm [shape: bf16[512,128], index: 3, kind: input, shape index: {}]   ;;  %s1033_s4 = inlined_call_operand.vmem [shape: f32[1,128], index: 4, kind: input, shape index: {}]   ;;  %s1034_s5 = inlined_call_operand.vmem [shape: bf16[128,32], index: 5, kind: input, shape index: {}]   ;;  %s1035_s6 = inlined_call_operand.vmem [shape: f32[1,32], index: 6, kind: input, shape index: {}]   ;;  %s1036_s7 = inlined_call_operand.vmem [shape: f32[8,32], index: 7, kind: output, shape index: {}]  }
   0x1   :  { %13 = vsyncpa [#allocation5], 0  ;;  %s921_s24 = smov [#allocation2]  }
   0x2   :  { %s21_s25 = sshll.u32 %s921_s24, 4  ;;  %s22_s25 = int_to_ptr.vmem [resolvable:$true] %s21_s25 }
   0x3   :  { %s885_s26 = scalar_lea.vmem %s22_s25, 2048  ;;  %p890_p1 = scmp.lt.s32.totalorder %s22_s25, %s22_s25 }
   0x4   :  { %p886_p0 = scmp.ne.s32.totalorder %s22_s25, %s885_s26  ;;  %p891_p2 = scmp.lt.s32.totalorder %s885_s26, %s885_s26 }
   0x6   :  { %p892_p3 = por %p891_p2, %p890_p1 }
   0x8   :  { %p893_p4 = pnand %p892_p3, %p886_p0 }
   0xa   :  { %896 = shalt.err (!%p893_p4)
}
   0xb   :  { %s922_s27 = smov 512   ;;  %s923_s28 = smov 32  }
   0xc   :  { %27 = dma.hbm_to_vmem [thread:$0]  %s1030_s1, 2048, %s22_s25, [#allocation3], %s922_s27, %s922_s27, %s923_s28  }
   0xd   :  { %s924_s8 = smov [#allocation4]  }
   0xe   :  { %s35_s9 = sshll.u32 %s924_s8, 4  ;;  %s36_s9 = int_to_ptr.vmem [resolvable:$true] %s35_s9 }
   0xf   :  { %s905_s10 = scalar_lea.vmem %s36_s9, 4096  ;;  %p910_p6 = scmp.lt.s32.totalorder %s36_s9, %s36_s9 }
  0x10   :  { %p906_p5 = scmp.ne.s32.totalorder %s36_s9, %s905_s10  ;;  %p911_p7 = scmp.lt.s32.totalorder %s905_s10, %s905_s10 }
  0x12   :  { %p912_p8 = por %p911_p7, %p910_p6 }
  0x14   :  { %p913_p9 = pnand %p912_p8, %p906_p5 }
  0x16   :  { %916 = shalt.err (!%p913_p9)
}
  0x17   :  { %s925_s11 = smov 64   ;;  %s926_s12 = smov 4  }
  0x18   :  { %41 = dma.hbm_to_vmem [thread:$0]  %s1032_s3, 4096, %s36_s9, [#allocation5], %s925_s11, %s925_s11, %s926_s12  }
  0x19   :  { %917 = dma.done.wait [#allocation3], 2048  }
  0x1a   :  { %918 = vsyncadd [#allocation3], 4294965248 }
  0x1b   :  { %919 = dma.done.wait [#allocation5], 4096  }
  0x1c   :  { %920 = vsyncadd [#allocation5], 4294963200  ;;  %v927_v0 = vmov 0.0   ;;  %v69_v1 = vld [vmem:[#allocation2 + $0x68] sm:$0xff]  ;;  %v68_v2 = vld [vmem:[#allocation2 + $0x60] sm:$0xff]  ;;  %vm94_vm0 = vcmask 261120   ;;  %v74_v50 = vlaneseq }
  0x1d   :  { %162 = vmatprep.mubr.f32.mxu1 %v927_v0  ;;  %v65_v3 = vld [vmem:[#allocation2 + $0x48] sm:$0xff]  ;;  %122 = vmatprep.subr.mxu1 %v69_v1  ;;  %v64_v4 = vld [vmem:[#allocation2 + $0x40] sm:$0xff]  ;;  %v71_v10 = vld [vmem:[#allocation2 + $0x78] sm:$0xff]  ;;  %vm929_vm1 = vmmov 0  }
  0x1e   :  { %123 = vmatpush1.msra.mxu1 %v68_v2  ;;  %v61_v5 = vld [vmem:[#allocation2 + $0x28] sm:$0xff]  ;;  %v60_v6 = vld [vmem:[#allocation2 + $0x20] sm:$0xff]  ;;  %v70_v11 = vld [vmem:[#allocation2 + $0x70] sm:$0xff]  ;;  %v75_v51 = vshrl.u32 %v74_v50, 7 }
  0x1f   :  { %124 = vmatprep.subr.mxu1 %v65_v3  ;;  %v57_v7 = vld [vmem:[#allocation2 + $0x8] sm:$0xff]  ;;  %v56_v8 = vld [vmem:[#allocation2] sm:$0xff]  ;;  %v67_v12 = vld [vmem:[#allocation2 + $0x58] sm:$0xff]  ;;  %v928_v3 = vmov 0  }
  0x20   :  { %125 = vmatpush1.msra.mxu1 %v64_v4  ;;  %v55_v9 = vld [vmem:[%s1029_s0] sm:$0xff]  ;;  %v837_v13 = vld [vmem:[#allocation4 + $0x78] sm:$0xff]   ;;  %v66_v14 = vld [vmem:[#allocation2 + $0x50] sm:$0xff]  ;;  %v76_v52 = vsub.s32 0, %v75_v51  ;;  %v80_v54 = vsub.s32 1, %v75_v51  ;;  %v84_v59 = vsub.s32 2, %v75_v51 }
  0x21   :  { %126 = vmatprep.subr.mxu1 %v61_v5  ;;  %v838_v15 = vld [vmem:[#allocation4 + $0x38] sm:$0xff]   ;;  %755 = vmatprep.subr.bf16.mxu0 %v837_v13  ;;  %v839_v17 = vld [vmem:[#allocation4 + $0x70] sm:$0xff]   ;;  %v841_v22 = vld [vmem:[#allocation4 + $0x68] sm:$0xff]   ;;  %v88_v62 = vsub.s32 3, %v75_v51 }
  0x22   :  { %127 = vmatpush1.msra.mxu1 %v60_v6  ;;  %v63_v16 = vld [vmem:[#allocation2 + $0x38] sm:$0xff]  ;;  %v62_v18 = vld [vmem:[#allocation2 + $0x30] sm:$0xff]  ;;  %756 = vmatpush3.bf16.msra.mxu0 %v838_v15  ;;  %v843_v24 = vld [vmem:[#allocation4 + $0x28] sm:$0xff]  }
  0x23   :  { %128 = vmatprep.subr.mxu1 %v57_v7  ;;  %v59_v19 = vld [vmem:[#allocation2 + $0x18] sm:$0xff]  ;;  %v840_v20 = vld [vmem:[#allocation4 + $0x30] sm:$0xff]   ;;  %757 = vmatprep.subr.bf16.mxu0 %v839_v17  ;;  %v845_v27 = vld [vmem:[#allocation4 + $0x60] sm:$0xff]  }
  0x24   :  { %129 = vmatpush1.msra.mxu1 %v56_v8  ;;  %v58_v21 = vld [vmem:[#allocation2 + $0x10] sm:$0xff]  ;;  %v842_v23 = vld [vmem:[#allocation4 + $0xf8] sm:$0xff]   ;;  %v847_v28 = vld [vmem:[#allocation4 + $0x20] sm:$0xff]  }
  0x25   :  { %711 = vmatmul.mubr.msk.f32.vlgmr.msra.gmra.mxu1 %vm94_vm0, %v55_v9  ;;  %193 = vmatprep.subr.mxu1 %v71_v10  ;;  %v844_v25 = vld [vmem:[#allocation4 + $0xb8] sm:$0xff]   ;;  %v846_v26 = vld [vmem:[#allocation4 + $0xf0] sm:$0xff]   ;;  %v850_v30 = vld [vmem:[#allocation4 + $0xe8] sm:$0xff]  }
  0x26   :  { %194 = vmatpush1.msra.mxu1 %v70_v11  ;;  %233 = vmatprep.mubr.f32.mxu1 %v927_v0  ;;  %v848_v29 = vld [vmem:[#allocation4 + $0xb0] sm:$0xff]   ;;  %v849_v31 = vld [vmem:[#allocation4 + $0x58] sm:$0xff]   ;;  %v852_v33 = vld [vmem:[#allocation4 + $0xa8] sm:$0xff]  }
  0x27   :  { %195 = vmatprep.subr.mxu1 %v67_v12  ;;  %758 = vmatpush3.bf16.msra.mxu0 %v840_v20  ;;  %v851_v32 = vld [vmem:[#allocation4 + $0x18] sm:$0xff]   ;;  %v854_v34 = vld [vmem:[#allocation4 + $0xe0] sm:$0xff]   ;;  %v853_v35 = vld [vmem:[#allocation4 + $0x50] sm:$0xff]  }
  0x28   :  { %196 = vmatpush1.msra.mxu1 %v66_v14  ;;  %759 = vmatprep.subr.bf16.mxu0 %v841_v22  ;;  %v855_v36 = vld [vmem:[#allocation4 + $0x10] sm:$0xff]   ;;  %v856_v37 = vld [vmem:[#allocation4 + $0xa0] sm:$0xff]   ;;  %v857_v38 = vld [vmem:[#allocation4 + $0x48] sm:$0xff]  }
  0x29   :  { %197 = vmatprep.subr.mxu1 %v63_v16  ;;  %v858_v39 = vld [vmem:[#allocation4 + $0xd8] sm:$0xff]   ;;  %v859_v40 = vld [vmem:[#allocation4 + $0x8] sm:$0xff]   ;;  %v861_v42 = vld [vmem:[#allocation4 + $0x40] sm:$0xff]  }
  0x2a   :  { %198 = vmatpush1.msra.mxu1 %v62_v18  ;;  %v860_v41 = vld [vmem:[#allocation4 + $0x98] sm:$0xff]   ;;  %v862_v43 = vld [vmem:[#allocation4 + $0xd0] sm:$0xff]   ;;  %v863_v44 = vld [vmem:[#allocation4] sm:$0xff]  }
  0x2b   :  { %199 = vmatprep.subr.mxu1 %v59_v19  ;;  %760 = vmatpush3.bf16.msra.mxu0 %v843_v24  ;;  %v864_v45 = vld [vmem:[#allocation4 + $0x90] sm:$0xff]   ;;  %v865_v46 = vld [vmem:[#allocation4 + $0xc8] sm:$0xff]   ;;  %v867_v48 = vld [vmem:[#allocation4 + $0xc0] sm:$0xff]  }
  0x2c   :  { %200 = vmatpush1.msra.mxu1 %v58_v21  ;;  %761 = vmatprep.subr.bf16.mxu0 %v845_v27  ;;  %v866_v47 = vld [vmem:[#allocation4 + $0x88] sm:$0xff]   ;;  %v868_v49 = vld [vmem:[#allocation4 + $0x80] sm:$0xff]   ;;  %v869_v6 = vld [vmem:[%s1034_s5 + $0x38] sm:$0xff]  }
  0x2d   :  { %712 = vmatmul.mubr.msk.f32.vlgmr.msra.gmra.mxu1 %vm94_vm0, %v55_v9  ;;  %777 = vmatprep.subr.bf16.mxu1 %v842_v23  ;;  %v72_v53 = vld [vmem:[%s1031_s2] sm:$0xf]  ;;  %v870_v12 = vld [vmem:[%s1034_s5 + $0x30] sm:$0xff]   ;;  %v871_v16 = vld [vmem:[%s1034_s5 + $0x28] sm:$0xff]  }
  0x2e   :  { %778 = vmatpush3.bf16.msra.mxu1 %v844_v25  ;;  %v77_v55 = vrot.slane %v72_v53, %v76_v52  ;;  %v81_v56 = vrot.slane %v72_v53, %v80_v54  ;;  %v85_v2 = vrot.slane %v72_v53, %v84_v59  ;;  %v89_v5 = vrot.slane %v72_v53, %v88_v62  ;;  %v872_v18 = vld [vmem:[%s1034_s5 + $0x20] sm:$0xff]   ;;  %v873_v19 = vld [vmem:[%s1034_s5 + $0x18] sm:$0xff]   ;;  %v874_v20 = vld [vmem:[%s1034_s5 + $0x10] sm:$0xff]  }
  0x2f   :  { %779 = vmatprep.subr.bf16.mxu1 %v846_v26  ;;  %762 = vmatpush3.bf16.msra.mxu0 %v847_v28  ;;  %v875_v21 = vld [vmem:[%s1034_s5 + $0x8] sm:$0xff]   ;;  %v876_v22 = vld [vmem:[%s1034_s5] sm:$0xff]  }
  0x30   :  { %763 = vmatprep.subr.bf16.mxu0 %v849_v31  ;;  %v713_v28 = vld [vmem:[%s1033_s4] ss:$0 sm:$0xff] }
  0x32   :  { %780 = vmatpush3.bf16.msra.mxu1 %v848_v29 }
  0x33   :  { %781 = vmatprep.subr.bf16.mxu1 %v850_v30  ;;  %764 = vmatpush3.bf16.msra.mxu0 %v851_v32 }
  0x34   :  { %765 = vmatprep.subr.bf16.mxu0 %v853_v35 }
  0x36   :  { %782 = vmatpush3.bf16.msra.mxu1 %v852_v33 }
  0x37   :  { %783 = vmatprep.subr.bf16.mxu1 %v854_v34  ;;  %766 = vmatpush3.bf16.msra.mxu0 %v855_v36 }
  0x38   :  { %767 = vmatprep.subr.bf16.mxu0 %v857_v38 }
  0x3a   :  { %784 = vmatpush3.bf16.msra.mxu1 %v856_v37 }
  0x3b   :  { %785 = vmatprep.subr.bf16.mxu1 %v858_v39  ;;  %768 = vmatpush3.bf16.msra.mxu0 %v859_v40 }
  0x3c   :  { %769 = vmatprep.subr.bf16.mxu0 %v861_v42 }
  0x3e   :  { %786 = vmatpush3.bf16.msra.mxu1 %v860_v41 }
  0x3f   :  { %787 = vmatprep.subr.bf16.mxu1 %v862_v43  ;;  %770 = vmatpush3.bf16.msra.mxu0 %v863_v44 }
  0x40   :  { %808 = vmatprep.subr.bf16.mxu0 %v927_v0 }
  0x42   :  { %788 = vmatpush3.bf16.msra.mxu1 %v864_v45 }
  0x43   :  { %789 = vmatprep.subr.bf16.mxu1 %v865_v46 }
  0x46   :  { %790 = vmatpush3.bf16.msra.mxu1 %v866_v47 }
  0x47   :  { %791 = vmatprep.subr.bf16.mxu1 %v867_v48 }
  0x4a   :  { %792 = vmatpush3.bf16.msra.mxu1 %v868_v49 }
  0xe5   :  { %v164_v57 = vpop.f32.mrf.mxu1 }
  0xe6   :  { %v165_v58 = vadd.f32 %v164_v57, %v77_v55 }
  0xe7   :  { %v166_v60 = vpop.f32.mrf.mxu1 }
  0xe8   :  { %v167_v61 = vadd.f32 %v166_v60, %v81_v56  ;;  %v240_v63 = vpack.c.bf16 %v165_v58, %v165_v58 }
  0xea   :  { %v241_v1 = vpack.c.bf16 %v167_v61, %v167_v61  ;;  %v244_v7 = vmax.bf16 %v928_v3, %v240_v63 }
  0xec   :  { %v245_v4 = vmax.bf16 %v928_v3, %v241_v1 }
  0xed   :  { %v235_v8 = vpop.f32.mrf.mxu1 }
  0xee   :  { %v236_v9 = vadd.f32 %v235_v8, %v85_v2  ;;  %543 = vmatprep.mubr.bf16.mxu0 %v245_v4 }
  0xef   :  { %v237_v10 = vpop.f32.mrf.mxu1  ;;  %544 = vmatmul.mubr.bf16.vlgmr.msra.gmra.mxu0 %v244_v7 }
  0xf0   :  { %v238_v11 = vadd.f32 %v237_v10, %v89_v5  ;;  %809 = vmatpush3.bf16.msra.mxu0 %v869_v6  ;;  %v242_v13 = vpack.c.bf16 %v236_v9, %v236_v9  ;;  %824 = vmatprep.mubr.msk.bf16.mxu0 %vm929_vm1, %v927_v0 }
  0xf1   :  { %810 = vmatprep.subr.bf16.mxu0 %v927_v0 }
  0xf2   :  { %v243_v14 = vpack.c.bf16 %v238_v11, %v238_v11  ;;  %v246_v17 = vmax.bf16 %v928_v3, %v242_v13 }
  0xf4   :  { %v247_v15 = vmax.bf16 %v928_v3, %v243_v14  ;;  %811 = vmatpush3.bf16.msra.mxu0 %v870_v12 }
  0xf5   :  { %812 = vmatprep.subr.bf16.mxu0 %v927_v0 }
  0xf6   :  { %583 = vmatprep.mubr.bf16.mxu1 %v247_v15 }
  0xf7   :  { %584 = vmatmul.mubr.bf16.vlgmr.msra.gmra.mxu1 %v246_v17 }
  0xf8   :  { %813 = vmatpush3.bf16.msra.mxu0 %v871_v16 }
  0xf9   :  { %814 = vmatprep.subr.bf16.mxu0 %v927_v0 }
  0xfc   :  { %815 = vmatpush3.bf16.msra.mxu0 %v872_v18 }
  0xfd   :  { %816 = vmatprep.subr.bf16.mxu0 %v927_v0 }
 0x100   :  { %817 = vmatpush3.bf16.msra.mxu0 %v873_v19 }
 0x101   :  { %818 = vmatprep.subr.bf16.mxu0 %v927_v0 }
 0x104   :  { %819 = vmatpush3.bf16.msra.mxu0 %v874_v20 }
 0x105   :  { %820 = vmatprep.subr.bf16.mxu0 %v927_v0 }
 0x108   :  { %821 = vmatpush3.bf16.msra.mxu0 %v875_v21 }
 0x109   :  { %822 = vmatprep.subr.bf16.mxu0 %v927_v0  ;;  %v746_v0 = vld [vmem:[%s1035_s6] ss:$0 sm:$0xff] }
 0x10c   :  { %823 = vmatpush3.bf16.msra.mxu0 %v876_v22 }
 0x1af   :  { %v771_v23 = vpop.f32.mrf.mxu0 }
 0x1b1   :  { %v772_v24 = vpop.f32.mrf.mxu0 }
 0x1b2   :  { %v773_v27 = vadd.f32 %v772_v24, %v771_v23 }
 0x1b3   :  { %v774_v25 = vpop.f32.mrf.mxu0 }
 0x1b4   :  { %v546_v31 = vadd.f32 %v773_v27, %v713_v28 }
 0x1b5   :  { %v775_v26 = vpop.f32.mrf.mxu0 }
 0x1b7   :  { %v793_v29 = vpop.f32.mrf.mxu1 }
 0x1b9   :  { %v794_v30 = vpop.f32.mrf.mxu1 }
 0x1ba   :  { %v795_v32 = vadd.f32 %v794_v30, %v793_v29 }
 0x1bb   :  { %v796_v33 = vpop.f32.mrf.mxu1 }
 0x1bc   :  { %v586_v34 = vadd.f32 %v795_v32, %v546_v31 }
 0x1bd   :  { %v797_v35 = vpop.f32.mrf.mxu1 }
 0x1be   :  { %v591_v36 = vpack.c.bf16 %v586_v34, %v586_v34 }
 0x1c0   :  { %v592_v37 = vmax.bf16 %v928_v3, %v591_v36 }
 0x1c2   :  { %825 = vmatmul.mubr.bf16.vlgmr.msra.gmra.mxu0 %v592_v37 }
 0x282   :  { %v698_v38 = vpop.f32.mrf.mxu0 }
 0x283   :  { %v699_v39 = vadd.f32 %v746_v0, %v698_v38 }
 0x284   :  { %v826_v40 = vpop.f32.mrf.mxu0 }
 0x285   :  { %704 = vst.msk [vmem:[%s1036_s7] sm:$0xff] %vm94_vm0, %v699_v39 }
 0x286   :  { %v701_v41 = vpop.f32.mrf.mxu0 }
 0x288   :  { %v827_v42 = vpop.f32.mrf.mxu0 }
 0x289   :  { %709 = vsyncpa [#allocation3], 1 }
 0x28a   :  { %710 = vsyncpa [#allocation5], 1 }

</bundles_post_ra>
